<compile_context>
chip_gen: v7x
topology: tpu7x:2x2x1
jax: 0.10.0
libtpu: 0.0.40
codegen_flags: <defaults>
</compile_context>

<pallas_src>
import functools

import jax
import jax.numpy as jnp
from jax.experimental import pallas as pl
from jax.experimental.pallas import tpu as pltpu


def _style_loss_kernel(fx_row_ref, ft_row_ref, fx_col_ref, ft_col_ref,
                       loss_ref, acc_ref, *, inv_hw, scale):
    # fx_row_ref/ft_row_ref : (tm, tk) row tiles of Fx / Ftarget
    # fx_col_ref/ft_col_ref : (tm, tk) column tiles of Fx / Ftarget
    # loss_ref              : (1, 1) resident scalar accumulator (output)
    # acc_ref               : (tm, tm) VMEM accumulator for the Gram-diff tile
    i = pl.program_id(0)
    j = pl.program_id(1)
    k = pl.program_id(2)
    nk = pl.num_programs(2)

    @pl.when((i == 0) & (j == 0) & (k == 0))
    def _():
        loss_ref[...] = jnp.zeros_like(loss_ref)

    @pl.when(k == 0)
    def _():
        acc_ref[...] = jnp.zeros_like(acc_ref)

    # Gram tile contributions: contract over the H*W chunk (last dim of both
    # operands) on the MXU with f32 accumulation.
    # TODO(synk): optionally cast the tiles to bf16 here for ~2x MXU throughput
    # on v6e/v7x (accumulator stays f32); kept f32 to track the reference.
    dims = (((1,), (1,)), ((), ()))
    gx = jax.lax.dot_general(fx_row_ref[...], fx_col_ref[...], dims,
                             preferred_element_type=jnp.float32)
    gt = jax.lax.dot_general(ft_row_ref[...], ft_col_ref[...], dims,
                             preferred_element_type=jnp.float32)
    acc_ref[...] += gx - gt

    @pl.when(k == nk - 1)
    def _():
        d = acc_ref[...] * inv_hw                               # Gram diff tile
        partial = jnp.sum(d * d, axis=(0, 1), keepdims=True)    # (1, 1)
        loss_ref[...] += partial * scale


def _round_up(a, m):
    return (a + m - 1) // m * m


def style_loss_forward(x, target, *, tile_bc=128, tile_hw=256):
    """Pallas StyleLoss.forward.

    Returns (x, loss): the PyTorch module returns x unchanged and stores the
    scalar in self.loss; here the loss is returned alongside x.
    """
    b, c, h, w = x.shape
    assert target.shape == x.shape
    bc, hw = b * c, h * w

    # Contiguous reshapes only -- no transpose / extra HBM pass in the wrapper.
    fx = x.reshape(bc, hw).astype(jnp.float32)
    ft = target.reshape(bc, hw).astype(jnp.float32)

    tm = min(tile_bc, _round_up(bc, 8))      # row/col tile of the Gram matrix
    tk = min(tile_hw, _round_up(hw, 128))    # contraction (H*W) chunk
    bc_p, hw_p = _round_up(bc, tm), _round_up(hw, tk)
    if (bc_p, hw_p) != (bc, hw):
        # Zero rows/cols contribute zero to BOTH Grams -> zero difference, so
        # padding never changes the loss (true bc/c/hw are used in `scale`).
        fx = jnp.pad(fx, ((0, bc_p - bc), (0, hw_p - hw)))
        ft = jnp.pad(ft, ((0, bc_p - bc), (0, hw_p - hw)))

    grid = (bc_p // tm, bc_p // tm, hw_p // tk)

    kernel = functools.partial(
        _style_loss_kernel,
        inv_hw=1.0 / float(hw),
        scale=1.0 / (float(bc) * float(bc) * float(c) * float(c)),
    )

    row_spec = pl.BlockSpec((tm, tk), lambda i, j, k: (i, k))
    col_spec = pl.BlockSpec((tm, tk), lambda i, j, k: (j, k))

    loss = pl.pallas_call(
        kernel,
        out_shape=jax.ShapeDtypeStruct((1, 1), jnp.float32),
        grid_spec=pltpu.PrefetchScalarGridSpec(
            num_scalar_prefetch=0,
            grid=grid,
            in_specs=[row_spec, row_spec, col_spec, col_spec],
            out_specs=pl.BlockSpec((1, 1), lambda i, j, k: (0, 0)),
            scratch_shapes=[pltpu.VMEM((tm, tm), jnp.float32)],
        ),
        compiler_params=pltpu.CompilerParams(
            # The scalar loss is accumulated across EVERY grid step, so no
            # axis may be megacore-sharded.
            dimension_semantics=("arbitrary", "arbitrary", "arbitrary"),
            vmem_limit_bytes=32 * 1024 * 1024,
        ),
    )(fx, ft, fx, ft)

    return x, loss[0, 0]


def style_loss_reference(x, target):
    """Pure-JAX reference of the PyTorch forward (f32, highest precision)."""
    b, c, h, w = x.shape
    fx = x.reshape(b * c, h * w).astype(jnp.float32)
    ft = target.reshape(b * c, h * w).astype(jnp.float32)
    gx = jnp.dot(fx, fx.T, precision=jax.lax.Precision.HIGHEST) / (h * w)
    gt = jnp.dot(ft, ft.T, precision=jax.lax.Precision.HIGHEST) / (h * w)
    return jnp.mean((gx - gt) ** 2) / (c * c)


if __name__ == "__main__":
    key = jax.random.PRNGKey(0)
    kx1, kt1, kx2, kt2 = jax.random.split(key, 4)

    # Case 1: MXU-friendly small shapes (B*C = 128 rows, H*W = 256 contraction).
    x1 = jax.random.normal(kx1, (2, 64, 16, 16), jnp.float32)
    t1 = jax.random.normal(kt1, (2, 64, 16, 16), jnp.float32)

    # Case 2: uneven shapes exercising padding + multi-tile (2,2,3) grid.
    x2 = jax.random.normal(kx2, (2, 128, 24, 24), jnp.float32)
    t2 = jax.random.normal(kt2, (2, 128, 24, 24), jnp.float32)

    for x, t in ((x1, t1), (x2, t2)):
        out, loss = style_loss_forward(x, t)
        out, loss = jax.block_until_ready((out, loss))
        ref = jax.block_until_ready(style_loss_reference(x, t))

        assert out.shape == x.shape and bool(jnp.all(out == x)), \
            "forward() must return x unchanged"
        err = abs(float(loss) - float(ref))
        tol = 2e-2 * max(float(ref), 1e-8)
        if err > tol:
            raise AssertionError(
                f"loss mismatch: pallas={float(loss)!r} ref={float(ref)!r}")

    print("KERNEL_OK")
</pallas_src>

<mosaic_0001>
module attributes {stable_mosaic.version = 11 : i64} {
  func.func @_style_loss_kernel(%arg0: i32, %arg1: i32, %arg2: i32, %arg3: memref<128x256xf32, #tpu.memory_space<vmem>>, %arg4: memref<128x256xf32, #tpu.memory_space<vmem>>, %arg5: memref<128x256xf32, #tpu.memory_space<vmem>>, %arg6: memref<128x256xf32, #tpu.memory_space<vmem>>, %arg7: memref<1x1xf32, #tpu.memory_space<vmem>>, %arg8: memref<128x128xf32, #tpu.memory_space<vmem>>) attributes {dimension_semantics = [#tpu.dimension_semantics<arbitrary>, #tpu.dimension_semantics<arbitrary>, #tpu.dimension_semantics<arbitrary>], iteration_bounds = array<i64: 1, 1, 1>, scalar_prefetch = 0 : i64, scratch_operands = 1 : i64, tpu.core_type = #tpu.core_type<tc>, window_params = [{transform_indices = @transform_0, window_bounds = array<i64: 128, 256>}, {transform_indices = @transform_1, window_bounds = array<i64: 128, 256>}, {transform_indices = @transform_2, window_bounds = array<i64: 128, 256>}, {transform_indices = @transform_3, window_bounds = array<i64: 128, 256>}, {pipeline_mode = #tpu.pipeline_mode<synchronous>, transform_indices = @transform_4, window_bounds = array<i64: 1, 1>}]} {
    %c0_i32 = arith.constant 0 : i32
    %0 = arith.cmpi eq, %arg0, %c0_i32 : i32
    %c0_i32_0 = arith.constant 0 : i32
    %1 = arith.cmpi eq, %arg1, %c0_i32_0 : i32
    %2 = arith.andi %0, %1 : i1
    %c0_i32_1 = arith.constant 0 : i32
    %3 = arith.cmpi eq, %arg2, %c0_i32_1 : i32
    %4 = arith.andi %2, %3 : i1
    %5 = arith.extui %4 : i1 to i32
    %c0_i32_2 = arith.constant 0 : i32
    %6 = arith.cmpi ne, %5, %c0_i32_2 : i32
    scf.if %6 {
      %cst_19 = arith.constant 0.000000e+00 : f32
      %23 = vector.broadcast %cst_19 : f32 to vector<1x1xf32>
      %c0_20 = arith.constant 0 : index
      %c0_21 = arith.constant 0 : index
      %24 = vector.load %arg7[%c0_20, %c0_21] : memref<1x1xf32, #tpu.memory_space<vmem>>, vector<1x1xf32>
      tpu.vector_store %arg7[%c0_20, %c0_21], %23 {strides = array<i32>} : memref<1x1xf32, #tpu.memory_space<vmem>>, vector<1x1xf32>,
    } else {
    }
    %c0_i32_3 = arith.constant 0 : i32
    %7 = arith.cmpi eq, %arg2, %c0_i32_3 : i32
    %8 = arith.extui %7 : i1 to i32
    %c0_i32_4 = arith.constant 0 : i32
    %9 = arith.cmpi ne, %8, %c0_i32_4 : i32
    scf.if %9 {
      %cst_19 = arith.constant 0.000000e+00 : f32
      %23 = vector.broadcast %cst_19 : f32 to vector<128x128xf32>
      %c0_20 = arith.constant 0 : index
      %c0_21 = arith.constant 0 : index
      %24 = vector.load %arg8[%c0_20, %c0_21] : memref<128x128xf32, #tpu.memory_space<vmem>>, vector<128x128xf32>
      tpu.vector_store %arg8[%c0_20, %c0_21], %23 {strides = array<i32>} : memref<128x128xf32, #tpu.memory_space<vmem>>, vector<128x128xf32>,
    } else {
    }
    %c0 = arith.constant 0 : index
    %c0_5 = arith.constant 0 : index
    %10 = vector.load %arg3[%c0, %c0_5] : memref<128x256xf32, #tpu.memory_space<vmem>>, vector<128x256xf32>
    %c0_6 = arith.constant 0 : index
    %c0_7 = arith.constant 0 : index
    %11 = vector.load %arg5[%c0_6, %c0_7] : memref<128x256xf32, #tpu.memory_space<vmem>>, vector<128x256xf32>
    %cst = arith.constant dense<0.000000e+00> : vector<128x128xf32>
    %12 = tpu.matmul %10, %11, %cst {dimension_numbers = #tpu.dot_dimension_numbers<[1], [1], [0], [0], [0, 0, 1, 0], [], []>} : vector<128x256xf32>, vector<128x256xf32>, vector<128x128xf32> -> vector<128x128xf32>
    %c0_8 = arith.constant 0 : index
    %c0_9 = arith.constant 0 : index
    %13 = vector.load %arg4[%c0_8, %c0_9] : memref<128x256xf32, #tpu.memory_space<vmem>>, vector<128x256xf32>
    %c0_10 = arith.constant 0 : index
    %c0_11 = arith.constant 0 : index
    %14 = vector.load %arg6[%c0_10, %c0_11] : memref<128x256xf32, #tpu.memory_space<vmem>>, vector<128x256xf32>
    %cst_12 = arith.constant dense<0.000000e+00> : vector<128x128xf32>
    %15 = tpu.matmul %13, %14, %cst_12 {dimension_numbers = #tpu.dot_dimension_numbers<[1], [1], [0], [0], [0, 0, 1, 0], [], []>} : vector<128x256xf32>, vector<128x256xf32>, vector<128x128xf32> -> vector<128x128xf32>
    %c0_13 = arith.constant 0 : index
    %c0_14 = arith.constant 0 : index
    %16 = vector.load %arg8[%c0_13, %c0_14] : memref<128x128xf32, #tpu.memory_space<vmem>>, vector<128x128xf32>
    %17 = arith.subf %12, %15 : vector<128x128xf32>
    %18 = arith.addf %16, %17 : vector<128x128xf32>
    %c0_15 = arith.constant 0 : index
    %c0_16 = arith.constant 0 : index
    %19 = vector.load %arg8[%c0_15, %c0_16] : memref<128x128xf32, #tpu.memory_space<vmem>>, vector<128x128xf32>
    tpu.vector_store %arg8[%c0_15, %c0_16], %18 {strides = array<i32>} : memref<128x128xf32, #tpu.memory_space<vmem>>, vector<128x128xf32>,
    %c0_i32_17 = arith.constant 0 : i32
    %20 = arith.cmpi eq, %arg2, %c0_i32_17 : i32
    %21 = arith.extui %20 : i1 to i32
    %c0_i32_18 = arith.constant 0 : i32
    %22 = arith.cmpi ne, %21, %c0_i32_18 : i32
    scf.if %22 {
      %c0_19 = arith.constant 0 : index
      %c0_20 = arith.constant 0 : index
      %23 = vector.load %arg8[%c0_19, %c0_20] : memref<128x128xf32, #tpu.memory_space<vmem>>, vector<128x128xf32>
      %cst_21 = arith.constant 3.906250e-03 : f32
      %24 = vector.broadcast %cst_21 : f32 to vector<128x128xf32>
      %25 = arith.mulf %23, %24 : vector<128x128xf32>
      %26 = arith.mulf %25, %25 : vector<128x128xf32>
      %27 = vector.shape_cast %26 : vector<128x128xf32> to vector<1x128x128xf32>
      %cst_22 = arith.constant dense<0.000000e+00> : vector<1xf32>
      %28 = vector.multi_reduction <add>, %27, %cst_22 [1, 2] : vector<1x128x128xf32> to vector<1xf32>
      %29 = vector.shape_cast %28 : vector<1xf32> to vector<1x1x1xf32>
      %30 = vector.extract %29[0, 0, 0] : f32 from vector<1x1x1xf32>
      %31 = vector.broadcast %30 : f32 to vector<1x1xf32>
      %c0_23 = arith.constant 0 : index
      %c0_24 = arith.constant 0 : index
      %32 = vector.load %arg7[%c0_23, %c0_24] : memref<1x1xf32, #tpu.memory_space<vmem>>, vector<1x1xf32>
      %cst_25 = arith.constant 1.49011612E-8 : f32
      %33 = vector.broadcast %cst_25 : f32 to vector<1x1xf32>
      %34 = arith.mulf %31, %33 : vector<1x1xf32>
      %35 = arith.addf %32, %34 : vector<1x1xf32>
      %c0_26 = arith.constant 0 : index
      %c0_27 = arith.constant 0 : index
      %36 = vector.load %arg7[%c0_26, %c0_27] : memref<1x1xf32, #tpu.memory_space<vmem>>, vector<1x1xf32>
      tpu.vector_store %arg7[%c0_26, %c0_27], %35 {strides = array<i32>} : memref<1x1xf32, #tpu.memory_space<vmem>>, vector<1x1xf32>,
    } else {
    }
    return
  }
  func.func @transform_0(%arg0: i32, %arg1: i32, %arg2: i32) -> (i32, i32) {
    %c0_i32 = arith.constant 0 : i32
    return %arg0, %arg2 : i32, i32
  }
  func.func @transform_1(%arg0: i32, %arg1: i32, %arg2: i32) -> (i32, i32) {
    %c0_i32 = arith.constant 0 : i32
    return %arg0, %arg2 : i32, i32
  }
  func.func @transform_2(%arg0: i32, %arg1: i32, %arg2: i32) -> (i32, i32) {
    %c0_i32 = arith.constant 0 : i32
    return %arg1, %arg2 : i32, i32
  }
  func.func @transform_3(%arg0: i32, %arg1: i32, %arg2: i32) -> (i32, i32) {
    %c0_i32 = arith.constant 0 : i32
    return %arg1, %arg2 : i32, i32
  }
  func.func @transform_4(%arg0: i32, %arg1: i32, %arg2: i32) -> (i32, i32) {
    %c0_i32 = arith.constant 0 : i32
    %c0_i32_0 = arith.constant 0 : i32
    %c0_i32_1 = arith.constant 0 : i32
    return %c0_i32, %c0_i32_0 : i32, i32
  }
}

</mosaic_0001>

<bundles_post_ra>
// kernel: tpu_custom_call.1
= control target key start
LH: loop header
LB: loop body
LE: loop exit
PB: predicated region body
PF: predicated region fallthrough
CT: control target
= control target key end

     0   :  { %9 = vsyncpa [#allocation4], 0  ;;  %s996_s0 = inlined_call_operand.hbm [shape: f32[128,256], index: 0, kind: input, shape index: {}]   ;;  %s997_s1 = inlined_call_operand.hbm [shape: f32[128,256], index: 1, kind: input, shape index: {}]   ;;  %s998_s2 = inlined_call_operand.hbm [shape: f32[128,256], index: 2, kind: input, shape index: {}]   ;;  %s999_s3 = inlined_call_operand.hbm [shape: f32[128,256], index: 3, kind: input, shape index: {}]   ;;  %s1000_s4 = inlined_call_operand.hbm [shape: f32[1,1], index: 4, kind: output, shape index: {}]  }
   0x1   :  { %10 = vsyncpa [#allocation7], 0 }
   0x2   :  { %11 = vsyncpa [#allocation10], 0 }
   0x3   :  { %12 = vsyncpa [#allocation5], 0  ;;  %s875_s15 = smov [#allocation6]   ;;  %s876_s17 = smov [#allocation3]  }
   0x4   :  { %s30_s16 = sshll.u32 %s875_s15, 4  ;;  %s18_s18 = sshll.u32 %s876_s17, 4  ;;  %s31_s16 = int_to_ptr.vmem [resolvable:$true] %s30_s16  ;;  %s908_s18 = int_to_ptr.vmem [resolvable:$true] %s18_s18 }
   0x5   :  { %s757_s21 = scalar_lea.hbm %s997_s1, 4096 }
   0x6   :  { %p758_p0 = scmp.ne.s32.totalorder %s997_s1, %s757_s21  ;;  %p761_p1 = scmp.lt.u32.totalorder %s757_s21, %s997_s1 }
   0x8   :  { %p763_p2 = pnand %p761_p1, %p758_p0 }
   0xa   :  { %766 = shalt.err (!%p763_p2)
}
   0xb   :  { %s767_s26 = scalar_lea.vmem %s31_s16, 4096  ;;  %p772_p4 = scmp.lt.s32.totalorder %s31_s16, %s31_s16 }
   0xc   :  { %p768_p3 = scmp.ne.s32.totalorder %s31_s16, %s767_s26  ;;  %p773_p5 = scmp.lt.s32.totalorder %s767_s26, %s767_s26 }
   0xe   :  { %p774_p6 = por %p773_p5, %p772_p4 }
  0x10   :  { %p775_p7 = pnand %p774_p6, %p768_p3 }
  0x12   :  { %778 = shalt.err (!%p775_p7)
}
  0x13   :  { %s877_s27 = smov 256   ;;  %s878_s28 = smov 16  }
  0x14   :  { %36 = dma.hbm_to_vmem [thread:$0]  %s997_s1, 4096, %s31_s16, [#allocation7], %s877_s27, %s877_s27, %s878_s28  }
  0x15   :  { %s779_s7 = scalar_lea.hbm %s996_s0, 4096 }
  0x16   :  { %p780_p8 = scmp.ne.s32.totalorder %s996_s0, %s779_s7  ;;  %p783_p9 = scmp.lt.u32.totalorder %s779_s7, %s996_s0 }
  0x18   :  { %p785_p10 = pnand %p783_p9, %p780_p8 }
  0x1a   :  { %788 = shalt.err (!%p785_p10)
}
  0x1b   :  { %s789_s12 = scalar_lea.vmem %s908_s18, 4096  ;;  %p794_p12 = scmp.lt.s32.totalorder %s908_s18, %s908_s18 }
  0x1c   :  { %p790_p11 = scmp.ne.s32.totalorder %s908_s18, %s789_s12  ;;  %p795_p13 = scmp.lt.s32.totalorder %s789_s12, %s789_s12 }
  0x1e   :  { %p796_p0 = por %p795_p13, %p794_p12 }
  0x20   :  { %p797_p1 = pnand %p796_p0, %p790_p11 }
  0x22   :  { %800 = shalt.err (!%p797_p1)
}
  0x23   :  { %24 = dma.hbm_to_vmem [thread:$0]  %s996_s0, 4096, %s908_s18, [#allocation4], %s877_s27, %s877_s27, %s878_s28  }
  0x24   :  { %s879_s14 = smov [#allocation8]   ;;  %s880_s16 = smov [#allocation9]  }
  0x25   :  { %s42_s15 = sshll.u32 %s879_s14, 4  ;;  %s54_s17 = sshll.u32 %s880_s16, 4  ;;  %s43_s15 = int_to_ptr.vmem [resolvable:$true] %s42_s15  ;;  %s945_s17 = int_to_ptr.vmem [resolvable:$true] %s54_s17 }
  0x26   :  { %s801_s21 = scalar_lea.hbm %s998_s2, 4096 }
  0x27   :  { %p802_p2 = scmp.ne.s32.totalorder %s998_s2, %s801_s21  ;;  %p805_p3 = scmp.lt.u32.totalorder %s801_s21, %s998_s2 }
  0x29   :  { %p807_p4 = pnand %p805_p3, %p802_p2 }
  0x2b   :  { %810 = shalt.err (!%p807_p4)
}
  0x2c   :  { %s811_s0 = scalar_lea.vmem %s43_s15, 4096  ;;  %p816_p6 = scmp.lt.s32.totalorder %s43_s15, %s43_s15 }
  0x2d   :  { %p812_p5 = scmp.ne.s32.totalorder %s43_s15, %s811_s0  ;;  %p817_p7 = scmp.lt.s32.totalorder %s811_s0, %s811_s0 }
  0x2f   :  { %p818_p8 = por %p817_p7, %p816_p6 }
  0x31   :  { %p819_p9 = pnand %p818_p8, %p812_p5 }
  0x33   :  { %822 = shalt.err (!%p819_p9)
}
  0x34   :  { %48 = dma.hbm_to_vmem [thread:$0]  %s998_s2, 4096, %s43_s15, [#allocation7], %s877_s27, %s877_s27, %s878_s28  }
  0x35   :  { %s823_s5 = scalar_lea.hbm %s999_s3, 4096 }
  0x36   :  { %p824_p10 = scmp.ne.s32.totalorder %s999_s3, %s823_s5  ;;  %p827_p11 = scmp.lt.u32.totalorder %s823_s5, %s999_s3 }
  0x38   :  { %p829_p12 = pnand %p827_p11, %p824_p10 }
  0x3a   :  { %832 = shalt.err (!%p829_p12)
}
  0x3b   :  { %s833_s10 = scalar_lea.vmem %s945_s17, 4096  ;;  %p838_p0 = scmp.lt.s32.totalorder %s945_s17, %s945_s17 }
  0x3c   :  { %p834_p13 = scmp.ne.s32.totalorder %s945_s17, %s833_s10  ;;  %p839_p1 = scmp.lt.s32.totalorder %s833_s10, %s833_s10 }
  0x3e   :  { %p840_p2 = por %p839_p1, %p838_p0 }
  0x40   :  { %p841_p3 = pnand %p840_p2, %p834_p13 }
  0x42   :  { %844 = shalt.err (!%p841_p3)
}
  0x43   :  { %60 = dma.hbm_to_vmem [thread:$0]  %s999_s3, 4096, %s945_s17, [#allocation10], %s877_s27, %s877_s27, %s878_s28  }
  0x44   :  { %867 = dma.done.wait [#allocation4], 4096  }
  0x45   :  { %868 = vsyncadd [#allocation4], 4294963200 }
  0x46   :  { %869 = dma.done.wait [#allocation7], 8192  }
  0x47   :  { %870 = vsyncadd [#allocation7], 4294959104 }
  0x48   :  { %871 = dma.done.wait [#allocation10], 4096  }
  0x49   :  { %872 = vsyncadd [#allocation10], 4294963200  ;;  %v136_v0 = vld [vmem:[#allocation8 + $0x8] sm:$0xff]  ;;  %v138_v1 = vld [vmem:[#allocation8 + $0x18] sm:$0xff]  ;;  %vm82_vm0 = vcmask 0   ;;  %s882_s27 = smov [#allocation11]  }
  0x4a   :  { %v345_v2 = vld [vmem:[#allocation9 + $0x8] sm:$0xff]  ;;  %v683_v3 = vpack.c.bf16 %v138_v1, %v136_v0  ;;  %v347_v4 = vld [vmem:[#allocation9 + $0x18] sm:$0xff]  ;;  %v135_v5 = vld [vmem:[#allocation8] sm:$0xff]  ;;  %s672_s28 = sshll.u32 %s882_s27, 4  ;;  %s673_s28 = int_to_ptr.vmem [resolvable:$true] %s672_s28 }
  0x4b   :  { %v137_v6 = vld [vmem:[#allocation8 + $0x10] sm:$0xff]  ;;  %v715_v7 = vpack.c.bf16 %v347_v4, %v345_v2  ;;  %v344_v9 = vld [vmem:[#allocation9] sm:$0xff]  ;;  %v140_v11 = vld [vmem:[#allocation8 + $0x28] sm:$0xff]  ;;  %s845_s12 = scalar_lea.vmem %s673_s28, 16  ;;  %s849_s1 = scalar_lea.vmem %s673_s28, 32 }
  0x4c   :  { %v685_v8 = vpack.c.bf16 %v137_v6, %v135_v5  ;;  %v346_v10 = vld [vmem:[#allocation9 + $0x10] sm:$0xff]  ;;  %684 = vmatprep.subr.bf16.mxu0 %v683_v3  ;;  %v142_v13 = vld [vmem:[#allocation8 + $0x38] sm:$0xff]  ;;  %v349_v14 = vld [vmem:[#allocation9 + $0x28] sm:$0xff]  ;;  %p846_p4 = scmp.ne.s32.totalorder %s673_s28, %s845_s12  ;;  %p850_p5 = scmp.lt.s32.totalorder %s673_s28, %s673_s28 }
  0x4d   :  { %v717_v12 = vpack.c.bf16 %v346_v10, %v344_v9  ;;  %v351_v15 = vld [vmem:[#allocation9 + $0x38] sm:$0xff]  ;;  %716 = vmatprep.subr.bf16.mxu1 %v715_v7  ;;  %v687_v16 = vpack.c.bf16 %v142_v13, %v140_v11  ;;  %v139_v18 = vld [vmem:[#allocation8 + $0x20] sm:$0xff]  ;;  %v141_v19 = vld [vmem:[#allocation8 + $0x30] sm:$0xff]  ;;  %p851_p6 = scmp.lt.s32.totalorder %s849_s1, %s845_s12 }
  0x4e   :  { %686 = vmatpush1.bf16.xpose.msra.mxu0 %v685_v8  ;;  %v719_v17 = vpack.c.bf16 %v351_v15, %v349_v14  ;;  %v348_v20 = vld [vmem:[#allocation9 + $0x20] sm:$0xff]  ;;  %v350_v21 = vld [vmem:[#allocation9 + $0x30] sm:$0xff]  ;;  %v144_v22 = vld [vmem:[#allocation8 + $0x48] sm:$0xff]  ;;  %v689_v26 = vpack.c.bf16 %v141_v19, %v139_v18 }
  0x4f   :  { %718 = vmatpush1.bf16.xpose.msra.mxu1 %v717_v12  ;;  %688 = vmatprep.subr.bf16.mxu0 %v687_v16  ;;  %v146_v23 = vld [vmem:[#allocation8 + $0x58] sm:$0xff]  ;;  %v353_v24 = vld [vmem:[#allocation9 + $0x48] sm:$0xff]  ;;  %v721_v27 = vpack.c.bf16 %v350_v21, %v348_v20  ;;  %v143_v30 = vld [vmem:[#allocation8 + $0x40] sm:$0xff]  ;;  %p852_p7 = por %p851_p6, %p850_p5 }
  0x50   :  { %720 = vmatprep.subr.bf16.mxu1 %v719_v17  ;;  %v355_v25 = vld [vmem:[#allocation9 + $0x58] sm:$0xff]  ;;  %v691_v28 = vpack.c.bf16 %v146_v23, %v144_v22  ;;  %v145_v31 = vld [vmem:[#allocation8 + $0x50] sm:$0xff]  ;;  %v352_v32 = vld [vmem:[#allocation9 + $0x40] sm:$0xff] }
  0x51   :  { %v723_v29 = vpack.c.bf16 %v355_v25, %v353_v24  ;;  %v354_v33 = vld [vmem:[#allocation9 + $0x50] sm:$0xff]  ;;  %v148_v34 = vld [vmem:[#allocation8 + $0x68] sm:$0xff]  ;;  %v150_v35 = vld [vmem:[#allocation8 + $0x78] sm:$0xff]  ;;  %v693_v38 = vpack.c.bf16 %v145_v31, %v143_v30  ;;  %p853_p8 = pnand %p852_p7, %p846_p4 }
  0x52   :  { %v357_v36 = vld [vmem:[#allocation9 + $0x68] sm:$0xff]  ;;  %v359_v37 = vld [vmem:[#allocation9 + $0x78] sm:$0xff]  ;;  %v725_v39 = vpack.c.bf16 %v354_v33, %v352_v32  ;;  %v695_v40 = vpack.c.bf16 %v150_v35, %v148_v34  ;;  %v147_v42 = vld [vmem:[#allocation8 + $0x60] sm:$0xff] }
  0x53   :  { %v727_v41 = vpack.c.bf16 %v359_v37, %v357_v36  ;;  %v149_v43 = vld [vmem:[#allocation8 + $0x70] sm:$0xff]  ;;  %v356_v44 = vld [vmem:[#allocation9 + $0x60] sm:$0xff]  ;;  %v104_v45 = vld [vmem:[#allocation3 + $0x8] sm:$0xff] }
  0x54   :  { %v313_v46 = vld [vmem:[#allocation6 + $0x8] sm:$0xff]  ;;  %v358_v47 = vld [vmem:[#allocation9 + $0x70] sm:$0xff]  ;;  %v154_v49 = vld [vmem:[#allocation8 + $0x98] sm:$0xff]  ;;  %231 = vmatprep.mubr.f32.mxu0 %v104_v45  ;;  %v697_v52 = vpack.c.bf16 %v149_v43, %v147_v42 }
  0x55   :  { %v152_v48 = vld [vmem:[#allocation8 + $0x88] sm:$0xff]  ;;  %v363_v51 = vld [vmem:[#allocation9 + $0x98] sm:$0xff]  ;;  %440 = vmatprep.mubr.f32.mxu1 %v313_v46  ;;  %v729_v53 = vpack.c.bf16 %v358_v47, %v356_v44  ;;  %v151_v56 = vld [vmem:[#allocation8 + $0x80] sm:$0xff] }
  0x56   :  { %690 = vmatpush1.bf16.xpose.msra.mxu0 %v689_v26  ;;  %v361_v50 = vld [vmem:[#allocation9 + $0x88] sm:$0xff]  ;;  %v699_v54 = vpack.c.bf16 %v154_v49, %v152_v48  ;;  %v153_v57 = vld [vmem:[#allocation8 + $0x90] sm:$0xff]  ;;  %v360_v58 = vld [vmem:[#allocation9 + $0x80] sm:$0xff] }
  0x57   :  { %722 = vmatpush1.bf16.xpose.msra.mxu1 %v721_v27  ;;  %692 = vmatprep.subr.bf16.mxu0 %v691_v28  ;;  %v731_v55 = vpack.c.bf16 %v363_v51, %v361_v50  ;;  %v362_v59 = vld [vmem:[#allocation9 + $0x90] sm:$0xff]  ;;  %v156_v60 = vld [vmem:[#allocation8 + $0xa8] sm:$0xff]  ;;  %v158_v61 = vld [vmem:[#allocation8 + $0xb8] sm:$0xff]  ;;  %v701_v0 = vpack.c.bf16 %v153_v57, %v151_v56 }
  0x58   :  { %724 = vmatprep.subr.bf16.mxu1 %v723_v29  ;;  %v365_v62 = vld [vmem:[#allocation9 + $0xa8] sm:$0xff]  ;;  %v367_v63 = vld [vmem:[#allocation9 + $0xb8] sm:$0xff]  ;;  %v733_v1 = vpack.c.bf16 %v362_v59, %v360_v58  ;;  %v703_v2 = vpack.c.bf16 %v158_v61, %v156_v60  ;;  %v155_v4 = vld [vmem:[#allocation8 + $0xa0] sm:$0xff] }
  0x59   :  { %v735_v3 = vpack.c.bf16 %v367_v63, %v365_v62  ;;  %v157_v5 = vld [vmem:[#allocation8 + $0xb0] sm:$0xff]  ;;  %v364_v6 = vld [vmem:[#allocation9 + $0xa0] sm:$0xff]  ;;  %v160_v8 = vld [vmem:[#allocation8 + $0xc8] sm:$0xff] }
  0x5a   :  { %v366_v7 = vld [vmem:[#allocation9 + $0xb0] sm:$0xff]  ;;  %v162_v9 = vld [vmem:[#allocation8 + $0xd8] sm:$0xff]  ;;  %v369_v10 = vld [vmem:[#allocation9 + $0xc8] sm:$0xff]  ;;  %v705_v12 = vpack.c.bf16 %v157_v5, %v155_v4 }
  0x5b   :  { %v371_v11 = vld [vmem:[#allocation9 + $0xd8] sm:$0xff]  ;;  %v737_v13 = vpack.c.bf16 %v366_v7, %v364_v6  ;;  %v707_v14 = vpack.c.bf16 %v162_v9, %v160_v8  ;;  %v159_v16 = vld [vmem:[#allocation8 + $0xc0] sm:$0xff]  ;;  %v161_v17 = vld [vmem:[#allocation8 + $0xd0] sm:$0xff] }
  0x5c   :  { %v739_v15 = vpack.c.bf16 %v371_v11, %v369_v10  ;;  %v368_v18 = vld [vmem:[#allocation9 + $0xc0] sm:$0xff]  ;;  %v370_v19 = vld [vmem:[#allocation9 + $0xd0] sm:$0xff]  ;;  %v164_v20 = vld [vmem:[#allocation8 + $0xe8] sm:$0xff]  ;;  %v709_v24 = vpack.c.bf16 %v161_v17, %v159_v16 }
  0x5d   :  { %v166_v21 = vld [vmem:[#allocation8 + $0xf8] sm:$0xff]  ;;  %v373_v22 = vld [vmem:[#allocation9 + $0xe8] sm:$0xff]  ;;  %v741_v25 = vpack.c.bf16 %v370_v19, %v368_v18  ;;  %v163_v28 = vld [vmem:[#allocation8 + $0xe0] sm:$0xff] }
  0x5e   :  { %694 = vmatpush1.bf16.xpose.msra.mxu0 %v693_v38  ;;  %v375_v23 = vld [vmem:[#allocation9 + $0xf8] sm:$0xff]  ;;  %v711_v26 = vpack.c.bf16 %v166_v21, %v164_v20  ;;  %v165_v29 = vld [vmem:[#allocation8 + $0xf0] sm:$0xff]  ;;  %v372_v30 = vld [vmem:[#allocation9 + $0xe0] sm:$0xff] }
  0x5f   :  { %726 = vmatpush1.bf16.xpose.msra.mxu1 %v725_v39  ;;  %696 = vmatprep.subr.bf16.mxu0 %v695_v40  ;;  %v743_v27 = vpack.c.bf16 %v375_v23, %v373_v22  ;;  %v374_v31 = vld [vmem:[#allocation9 + $0xf0] sm:$0xff]  ;;  %v713_v32 = vpack.c.bf16 %v165_v29, %v163_v28  ;;  %v103_v34 = vld [vmem:[#allocation3] sm:$0xff]  ;;  %v106_v36 = vld [vmem:[#allocation3 + $0x18] sm:$0xff] }
  0x60   :  { %728 = vmatprep.subr.bf16.mxu1 %v727_v41  ;;  %v745_v33 = vpack.c.bf16 %v374_v31, %v372_v30  ;;  %v312_v35 = vld [vmem:[#allocation6] sm:$0xff]  ;;  %v315_v37 = vld [vmem:[#allocation6 + $0x18] sm:$0xff]  ;;  %v105_v38 = vld [vmem:[#allocation3 + $0x10] sm:$0xff] }
  0x61   :  { %v314_v39 = vld [vmem:[#allocation6 + $0x10] sm:$0xff]  ;;  %v108_v40 = vld [vmem:[#allocation3 + $0x28] sm:$0xff]  ;;  %v107_v42 = vld [vmem:[#allocation3 + $0x20] sm:$0xff] }
  0x62   :  { %v317_v41 = vld [vmem:[#allocation6 + $0x28] sm:$0xff]  ;;  %v316_v43 = vld [vmem:[#allocation6 + $0x20] sm:$0xff]  ;;  %v110_v44 = vld [vmem:[#allocation3 + $0x38] sm:$0xff] }
  0x63   :  { %v319_v45 = vld [vmem:[#allocation6 + $0x38] sm:$0xff]  ;;  %v109_v46 = vld [vmem:[#allocation3 + $0x30] sm:$0xff]  ;;  %v112_v48 = vld [vmem:[#allocation3 + $0x48] sm:$0xff] }
  0x64   :  { %v318_v47 = vld [vmem:[#allocation6 + $0x30] sm:$0xff]  ;;  %v321_v49 = vld [vmem:[#allocation6 + $0x48] sm:$0xff]  ;;  %v111_v50 = vld [vmem:[#allocation3 + $0x40] sm:$0xff] }
  0x65   :  { %v320_v51 = vld [vmem:[#allocation6 + $0x40] sm:$0xff]  ;;  %v116_v56 = vld [vmem:[#allocation3 + $0x68] sm:$0xff]  ;;  %v118_v60 = vld [vmem:[#allocation3 + $0x78] sm:$0xff] }
  0x66   :  { %698 = vmatpush1.bf16.xpose.msra.mxu0 %v697_v52  ;;  %v114_v52 = vld [vmem:[#allocation3 + $0x58] sm:$0xff]  ;;  %v325_v57 = vld [vmem:[#allocation6 + $0x68] sm:$0xff]  ;;  %v115_v58 = vld [vmem:[#allocation3 + $0x60] sm:$0xff] }
  0x67   :  { %730 = vmatpush1.bf16.xpose.msra.mxu1 %v729_v53  ;;  %700 = vmatprep.subr.bf16.mxu0 %v699_v54  ;;  %v323_v53 = vld [vmem:[#allocation6 + $0x58] sm:$0xff]  ;;  %v113_v54 = vld [vmem:[#allocation3 + $0x50] sm:$0xff]  ;;  %v324_v59 = vld [vmem:[#allocation6 + $0x60] sm:$0xff] }
  0x68   :  { %732 = vmatprep.subr.bf16.mxu1 %v731_v55  ;;  %v322_v55 = vld [vmem:[#allocation6 + $0x50] sm:$0xff]  ;;  %v327_v61 = vld [vmem:[#allocation6 + $0x78] sm:$0xff]  ;;  %v124_v8 = vld [vmem:[#allocation3 + $0xa8] sm:$0xff] }
  0x69   :  { %v117_v62 = vld [vmem:[#allocation3 + $0x70] sm:$0xff]  ;;  %v122_v4 = vld [vmem:[#allocation3 + $0x98] sm:$0xff]  ;;  %v333_v9 = vld [vmem:[#allocation6 + $0xa8] sm:$0xff] }
  0x6a   :  { %v326_v63 = vld [vmem:[#allocation6 + $0x70] sm:$0xff]  ;;  %v331_v5 = vld [vmem:[#allocation6 + $0x98] sm:$0xff]  ;;  %v123_v10 = vld [vmem:[#allocation3 + $0xa0] sm:$0xff] }
  0x6b   :  { %v121_v6 = vld [vmem:[#allocation3 + $0x90] sm:$0xff]  ;;  %v332_v11 = vld [vmem:[#allocation6 + $0xa0] sm:$0xff]  ;;  %v128_v16 = vld [vmem:[#allocation3 + $0xc8] sm:$0xff] }
  0x6c   :  { %v330_v7 = vld [vmem:[#allocation6 + $0x90] sm:$0xff]  ;;  %v337_v17 = vld [vmem:[#allocation6 + $0xc8] sm:$0xff]  ;;  %v127_v18 = vld [vmem:[#allocation3 + $0xc0] sm:$0xff] }
  0x6d   :  { %v336_v19 = vld [vmem:[#allocation6 + $0xc0] sm:$0xff]  ;;  %v130_v20 = vld [vmem:[#allocation3 + $0xd8] sm:$0xff]  ;;  %v129_v22 = vld [vmem:[#allocation3 + $0xd0] sm:$0xff] }
  0x6e   :  { %702 = vmatpush1.bf16.xpose.msra.mxu0 %v701_v0  ;;  %v120_v0 = vld [vmem:[#allocation3 + $0x88] sm:$0xff]  ;;  %v339_v21 = vld [vmem:[#allocation6 + $0xd8] sm:$0xff]  ;;  %v338_v23 = vld [vmem:[#allocation6 + $0xd0] sm:$0xff] }
  0x6f   :  { %734 = vmatpush1.bf16.xpose.msra.mxu1 %v733_v1  ;;  %704 = vmatprep.subr.bf16.mxu0 %v703_v2  ;;  %v329_v1 = vld [vmem:[#allocation6 + $0x88] sm:$0xff]  ;;  %v119_v2 = vld [vmem:[#allocation3 + $0x80] sm:$0xff]  ;;  %v134_v28 = vld [vmem:[#allocation3 + $0xf8] sm:$0xff] }
  0x70   :  { %736 = vmatprep.subr.bf16.mxu1 %v735_v3  ;;  %v328_v3 = vld [vmem:[#allocation6 + $0x80] sm:$0xff]  ;;  %v343_v29 = vld [vmem:[#allocation6 + $0xf8] sm:$0xff]  ;;  %v133_v30 = vld [vmem:[#allocation3 + $0xf0] sm:$0xff] }
  0x71   :  { %v342_v31 = vld [vmem:[#allocation6 + $0xf0] sm:$0xff] }
  0x76   :  { %706 = vmatpush1.bf16.xpose.msra.mxu0 %v705_v12  ;;  %v126_v12 = vld [vmem:[#allocation3 + $0xb8] sm:$0xff] }
  0x77   :  { %738 = vmatpush1.bf16.xpose.msra.mxu1 %v737_v13  ;;  %708 = vmatprep.subr.bf16.mxu0 %v707_v14  ;;  %v335_v13 = vld [vmem:[#allocation6 + $0xb8] sm:$0xff]  ;;  %v125_v14 = vld [vmem:[#allocation3 + $0xb0] sm:$0xff] }
  0x78   :  { %740 = vmatprep.subr.bf16.mxu1 %v739_v15  ;;  %v334_v15 = vld [vmem:[#allocation6 + $0xb0] sm:$0xff] }
  0x7e   :  { %710 = vmatpush1.bf16.xpose.msra.mxu0 %v709_v24  ;;  %v132_v24 = vld [vmem:[#allocation3 + $0xe8] sm:$0xff] }
  0x7f   :  { %742 = vmatpush1.bf16.xpose.msra.mxu1 %v741_v25  ;;  %712 = vmatprep.subr.bf16.mxu0 %v711_v26  ;;  %v341_v25 = vld [vmem:[#allocation6 + $0xe8] sm:$0xff]  ;;  %v131_v26 = vld [vmem:[#allocation3 + $0xe0] sm:$0xff] }
  0x80   :  { %744 = vmatprep.subr.bf16.mxu1 %v743_v27  ;;  %v340_v27 = vld [vmem:[#allocation6 + $0xe0] sm:$0xff] }
  0x86   :  { %714 = vmatpush1.bf16.xpose.msra.mxu0 %v713_v32 }
  0x87   :  { %746 = vmatpush1.bf16.xpose.msra.mxu1 %v745_v33 }
  0x8d   :  { %232 = vmatmul.mubr.f32.vlgmr.msra.gmra.mrb[0].mxu0 %v103_v34 }
  0x8e   :  { %441 = vmatmul.mubr.f32.vlgmr.msra.gmra.mrb[0].mxu1 %v312_v35  ;;  %236 = vmatprep.mubr.f32.mxu0 %v106_v36 }
  0x8f   :  { %445 = vmatprep.mubr.f32.mxu1 %v315_v37 }
  0x91   :  { %237 = vmatmul.mubr.f32.gmra.mrb[2].mxu0 %v105_v38 }
  0x92   :  { %446 = vmatmul.mubr.f32.gmra.mrb[2].mxu1 %v314_v39  ;;  %241 = vmatprep.mubr.f32.mxu0 %v108_v40 }
  0x93   :  { %450 = vmatprep.mubr.f32.mxu1 %v317_v41 }
  0x95   :  { %242 = vmatmul.mubr.f32.gmra.mrb[4].mxu0 %v107_v42 }
  0x96   :  { %451 = vmatmul.mubr.f32.gmra.mrb[4].mxu1 %v316_v43  ;;  %246 = vmatprep.mubr.f32.mxu0 %v110_v44 }
  0x97   :  { %455 = vmatprep.mubr.f32.mxu1 %v319_v45 }
  0x99   :  { %247 = vmatmul.mubr.f32.gmra.mrb[6].mxu0 %v109_v46 }
  0x9a   :  { %456 = vmatmul.mubr.f32.gmra.mrb[6].mxu1 %v318_v47  ;;  %251 = vmatprep.mubr.f32.mxu0 %v112_v48 }
  0x9b   :  { %460 = vmatprep.mubr.f32.mxu1 %v321_v49 }
  0x9d   :  { %252 = vmatmul.mubr.f32.gmra.mrb[8].mxu0 %v111_v50 }
  0x9e   :  { %461 = vmatmul.mubr.f32.gmra.mrb[8].mxu1 %v320_v51  ;;  %256 = vmatprep.mubr.f32.mxu0 %v114_v52 }
  0x9f   :  { %465 = vmatprep.mubr.f32.mxu1 %v323_v53 }
  0xa1   :  { %257 = vmatmul.mubr.f32.gmra.mrb[10].mxu0 %v113_v54 }
  0xa2   :  { %466 = vmatmul.mubr.f32.gmra.mrb[10].mxu1 %v322_v55  ;;  %261 = vmatprep.mubr.f32.mxu0 %v116_v56 }
  0xa3   :  { %470 = vmatprep.mubr.f32.mxu1 %v325_v57 }
  0xa5   :  { %262 = vmatmul.mubr.f32.gmra.mrb[12].mxu0 %v115_v58 }
  0xa6   :  { %471 = vmatmul.mubr.f32.gmra.mrb[12].mxu1 %v324_v59  ;;  %266 = vmatprep.mubr.f32.mxu0 %v118_v60 }
  0xa7   :  { %475 = vmatprep.mubr.f32.mxu1 %v327_v61 }
  0xa9   :  { %267 = vmatmul.mubr.f32.gmra.mrb[14].mxu0 %v117_v62 }
  0xaa   :  { %476 = vmatmul.mubr.f32.gmra.mrb[14].mxu1 %v326_v63  ;;  %271 = vmatprep.mubr.f32.mxu0 %v120_v0 }
  0xab   :  { %480 = vmatprep.mubr.f32.mxu1 %v329_v1 }
  0xad   :  { %272 = vmatmul.mubr.f32.gmra.mrb[16].mxu0 %v119_v2 }
  0xae   :  { %481 = vmatmul.mubr.f32.gmra.mrb[16].mxu1 %v328_v3  ;;  %276 = vmatprep.mubr.f32.mxu0 %v122_v4 }
  0xaf   :  { %485 = vmatprep.mubr.f32.mxu1 %v331_v5 }
  0xb1   :  { %277 = vmatmul.mubr.f32.gmra.mrb[18].mxu0 %v121_v6 }
  0xb2   :  { %486 = vmatmul.mubr.f32.gmra.mrb[18].mxu1 %v330_v7  ;;  %281 = vmatprep.mubr.f32.mxu0 %v124_v8 }
  0xb3   :  { %490 = vmatprep.mubr.f32.mxu1 %v333_v9 }
  0xb5   :  { %282 = vmatmul.mubr.f32.gmra.mrb[20].mxu0 %v123_v10 }
  0xb6   :  { %491 = vmatmul.mubr.f32.gmra.mrb[20].mxu1 %v332_v11  ;;  %286 = vmatprep.mubr.f32.mxu0 %v126_v12 }
  0xb7   :  { %495 = vmatprep.mubr.f32.mxu1 %v335_v13 }
  0xb9   :  { %287 = vmatmul.mubr.f32.gmra.mrb[22].mxu0 %v125_v14 }
  0xba   :  { %496 = vmatmul.mubr.f32.gmra.mrb[22].mxu1 %v334_v15  ;;  %291 = vmatprep.mubr.f32.mxu0 %v128_v16 }
  0xbb   :  { %500 = vmatprep.mubr.f32.mxu1 %v337_v17 }
  0xbd   :  { %292 = vmatmul.mubr.f32.gmra.mrb[24].mxu0 %v127_v18 }
  0xbe   :  { %501 = vmatmul.mubr.f32.gmra.mrb[24].mxu1 %v336_v19  ;;  %296 = vmatprep.mubr.f32.mxu0 %v130_v20 }
  0xbf   :  { %505 = vmatprep.mubr.f32.mxu1 %v339_v21 }
  0xc1   :  { %297 = vmatmul.mubr.f32.gmra.mrb[26].mxu0 %v129_v22 }
  0xc2   :  { %506 = vmatmul.mubr.f32.gmra.mrb[26].mxu1 %v338_v23  ;;  %301 = vmatprep.mubr.f32.mxu0 %v132_v24 }
  0xc3   :  { %510 = vmatprep.mubr.f32.mxu1 %v341_v25 }
  0xc5   :  { %302 = vmatmul.mubr.f32.gmra.mrb[28].mxu0 %v131_v26 }
  0xc6   :  { %511 = vmatmul.mubr.f32.gmra.mrb[28].mxu1 %v340_v27  ;;  %306 = vmatprep.mubr.f32.mxu0 %v134_v28 }
  0xc7   :  { %515 = vmatprep.mubr.f32.mxu1 %v343_v29 }
  0xc9   :  { %307 = vmatmul.mubr.f32.gmra.mrb[30].mxu0 %v133_v30 }
  0xca   :  { %516 = vmatmul.mubr.f32.gmra.mrb[30].mxu1 %v342_v31 }
 0x160   :  { %v233_v32 = vpop.f32.mrb[0].mxu0 }
 0x161   :  { %v442_v33 = vpop.f32.mrb[0].mxu1  ;;  %v235_v34 = vpop.f32.mrb[1].mxu0 }
 0x162   :  { %v537_v35 = vsub.f32 %v233_v32, %v442_v33  ;;  %v444_v36 = vpop.f32.mrb[1].mxu1 }
 0x164   :  { %v238_v37 = vpop.f32.mrb[2].mxu0  ;;  %v604_v40 = vmul.f32 0.00390625, %v537_v35 }
 0x165   :  { %v447_v38 = vpop.f32.mrb[2].mxu1  ;;  %v240_v39 = vpop.f32.mrb[3].mxu0 }
 0x166   :  { %v538_v41 = vsub.f32 %v238_v37, %v447_v38  ;;  %v449_v42 = vpop.f32.mrb[3].mxu1  ;;  %v620_v47 = vmul.f32 %v604_v40, %v604_v40 }
 0x168   :  { %v605_v43 = vmul.f32 0.00390625, %v538_v41  ;;  %v243_v44 = vpop.f32.mrb[4].mxu0 }
 0x169   :  { %v452_v45 = vpop.f32.mrb[4].mxu1  ;;  %v245_v46 = vpop.f32.mrb[5].mxu0 }
 0x16a   :  { %v621_v48 = vmul.f32 %v605_v43, %v605_v43  ;;  %v539_v49 = vsub.f32 %v243_v44, %v452_v45  ;;  %v454_v50 = vpop.f32.mrb[5].mxu1 }
 0x16c   :  { %v636_v51 = vadd.f32 %v621_v48, %v620_v47  ;;  %v606_v52 = vmul.f32 0.00390625, %v539_v49  ;;  %v248_v53 = vpop.f32.mrb[6].mxu0 }
 0x16d   :  { %v457_v54 = vpop.f32.mrb[6].mxu1  ;;  %v250_v55 = vpop.f32.mrb[7].mxu0 }
 0x16e   :  { %v622_v56 = vmul.f32 %v606_v52, %v606_v52  ;;  %v540_v57 = vsub.f32 %v248_v53, %v457_v54  ;;  %v459_v58 = vpop.f32.mrb[7].mxu1 }
 0x170   :  { %v637_v59 = vadd.f32 %v636_v51, %v622_v56  ;;  %v607_v60 = vmul.f32 0.00390625, %v540_v57  ;;  %v253_v61 = vpop.f32.mrb[8].mxu0 }
 0x171   :  { %v462_v62 = vpop.f32.mrb[8].mxu1  ;;  %v255_v63 = vpop.f32.mrb[9].mxu0 }
 0x172   :  { %v623_v0 = vmul.f32 %v607_v60, %v607_v60  ;;  %v541_v1 = vsub.f32 %v253_v61, %v462_v62  ;;  %v464_v2 = vpop.f32.mrb[9].mxu1 }
 0x174   :  { %v638_v3 = vadd.f32 %v637_v59, %v623_v0  ;;  %v608_v4 = vmul.f32 0.00390625, %v541_v1  ;;  %v258_v5 = vpop.f32.mrb[10].mxu0 }
 0x175   :  { %v467_v6 = vpop.f32.mrb[10].mxu1  ;;  %v260_v7 = vpop.f32.mrb[11].mxu0 }
 0x176   :  { %v624_v8 = vmul.f32 %v608_v4, %v608_v4  ;;  %v542_v9 = vsub.f32 %v258_v5, %v467_v6  ;;  %v469_v10 = vpop.f32.mrb[11].mxu1 }
 0x178   :  { %v639_v11 = vadd.f32 %v638_v3, %v624_v8  ;;  %v609_v12 = vmul.f32 0.00390625, %v542_v9  ;;  %v263_v13 = vpop.f32.mrb[12].mxu0 }
 0x179   :  { %v472_v14 = vpop.f32.mrb[12].mxu1  ;;  %v265_v15 = vpop.f32.mrb[13].mxu0 }
 0x17a   :  { %v625_v16 = vmul.f32 %v609_v12, %v609_v12  ;;  %v543_v17 = vsub.f32 %v263_v13, %v472_v14  ;;  %v474_v18 = vpop.f32.mrb[13].mxu1 }
 0x17c   :  { %v640_v19 = vadd.f32 %v639_v11, %v625_v16  ;;  %v610_v20 = vmul.f32 0.00390625, %v543_v17  ;;  %v268_v21 = vpop.f32.mrb[14].mxu0 }
 0x17d   :  { %v477_v22 = vpop.f32.mrb[14].mxu1  ;;  %v270_v23 = vpop.f32.mrb[15].mxu0 }
 0x17e   :  { %v626_v24 = vmul.f32 %v610_v20, %v610_v20  ;;  %v544_v25 = vsub.f32 %v268_v21, %v477_v22  ;;  %v479_v26 = vpop.f32.mrb[15].mxu1 }
 0x180   :  { %v641_v27 = vadd.f32 %v640_v19, %v626_v24  ;;  %v611_v28 = vmul.f32 0.00390625, %v544_v25  ;;  %v273_v29 = vpop.f32.mrb[16].mxu0 }
 0x181   :  { %v482_v30 = vpop.f32.mrb[16].mxu1  ;;  %v275_v31 = vpop.f32.mrb[17].mxu0 }
 0x182   :  { %v627_v32 = vmul.f32 %v611_v28, %v611_v28  ;;  %v545_v33 = vsub.f32 %v273_v29, %v482_v30  ;;  %v484_v34 = vpop.f32.mrb[17].mxu1  ;;  %v881_v31 = vmov 0.0  }
 0x183   :  { %83 = vst.msk [vmem:[#allocation11] sm:$0x1] %vm82_vm0, %v881_v31 }
 0x184   :  { %v642_v35 = vadd.f32 %v641_v27, %v627_v32  ;;  %v612_v36 = vmul.f32 0.00390625, %v545_v33  ;;  %v278_v37 = vpop.f32.mrb[18].mxu0 }
 0x185   :  { %v487_v38 = vpop.f32.mrb[18].mxu1  ;;  %v280_v39 = vpop.f32.mrb[19].mxu0 }
 0x186   :  { %v628_v40 = vmul.f32 %v612_v36, %v612_v36  ;;  %v546_v41 = vsub.f32 %v278_v37, %v487_v38  ;;  %v489_v42 = vpop.f32.mrb[19].mxu1 }
 0x188   :  { %v643_v43 = vadd.f32 %v642_v35, %v628_v40  ;;  %v613_v44 = vmul.f32 0.00390625, %v546_v41  ;;  %v283_v45 = vpop.f32.mrb[20].mxu0 }
 0x189   :  { %v492_v46 = vpop.f32.mrb[20].mxu1  ;;  %v285_v47 = vpop.f32.mrb[21].mxu0 }
 0x18a   :  { %v629_v48 = vmul.f32 %v613_v44, %v613_v44  ;;  %v547_v49 = vsub.f32 %v283_v45, %v492_v46  ;;  %v494_v50 = vpop.f32.mrb[21].mxu1  ;;  %v661_v40 = vld [vmem:[#allocation11] sm:$0x1] }
 0x18c   :  { %v644_v51 = vadd.f32 %v643_v43, %v629_v48  ;;  %v614_v52 = vmul.f32 0.00390625, %v547_v49  ;;  %v288_v53 = vpop.f32.mrb[22].mxu0 }
 0x18d   :  { %v497_v54 = vpop.f32.mrb[22].mxu1  ;;  %v290_v55 = vpop.f32.mrb[23].mxu0 }
 0x18e   :  { %v630_v56 = vmul.f32 %v614_v52, %v614_v52  ;;  %v548_v57 = vsub.f32 %v288_v53, %v497_v54  ;;  %v499_v58 = vpop.f32.mrb[23].mxu1 }
 0x190   :  { %v645_v59 = vadd.f32 %v644_v51, %v630_v56  ;;  %v615_v60 = vmul.f32 0.00390625, %v548_v57  ;;  %v293_v61 = vpop.f32.mrb[24].mxu0 }
 0x191   :  { %v502_v62 = vpop.f32.mrb[24].mxu1  ;;  %v295_v63 = vpop.f32.mrb[25].mxu0 }
 0x192   :  { %v631_v0 = vmul.f32 %v615_v60, %v615_v60  ;;  %v549_v1 = vsub.f32 %v293_v61, %v502_v62  ;;  %v504_v2 = vpop.f32.mrb[25].mxu1 }
 0x194   :  { %v646_v3 = vadd.f32 %v645_v59, %v631_v0  ;;  %v616_v4 = vmul.f32 0.00390625, %v549_v1  ;;  %v298_v5 = vpop.f32.mrb[26].mxu0 }
 0x195   :  { %v507_v6 = vpop.f32.mrb[26].mxu1  ;;  %v300_v7 = vpop.f32.mrb[27].mxu0 }
 0x196   :  { %v632_v8 = vmul.f32 %v616_v4, %v616_v4  ;;  %v550_v9 = vsub.f32 %v298_v5, %v507_v6  ;;  %v509_v10 = vpop.f32.mrb[27].mxu1 }
 0x198   :  { %v647_v11 = vadd.f32 %v646_v3, %v632_v8  ;;  %v617_v12 = vmul.f32 0.00390625, %v550_v9  ;;  %v303_v13 = vpop.f32.mrb[28].mxu0 }
 0x199   :  { %v512_v14 = vpop.f32.mrb[28].mxu1  ;;  %v305_v15 = vpop.f32.mrb[29].mxu0 }
 0x19a   :  { %v633_v16 = vmul.f32 %v617_v12, %v617_v12  ;;  %v551_v17 = vsub.f32 %v303_v13, %v512_v14  ;;  %v514_v18 = vpop.f32.mrb[29].mxu1 }
 0x19c   :  { %v648_v19 = vadd.f32 %v647_v11, %v633_v16  ;;  %v618_v20 = vmul.f32 0.00390625, %v551_v17  ;;  %v308_v21 = vpop.f32.mrb[30].mxu0 }
 0x19d   :  { %v517_v22 = vpop.f32.mrb[30].mxu1  ;;  %v310_v23 = vpop.f32.mrb[31].mxu0 }
 0x19e   :  { %v634_v24 = vmul.f32 %v618_v20, %v618_v20  ;;  %v552_v25 = vsub.f32 %v308_v21, %v517_v22  ;;  %v519_v26 = vpop.f32.mrb[31].mxu1 }
 0x1a0   :  { %v619_v27 = vmul.f32 0.00390625, %v552_v25  ;;  %v649_v28 = vadd.f32 %v648_v19, %v634_v24 }
 0x1a2   :  { %v635_v29 = vmul.f32 %v619_v27, %v619_v27 }
 0x1a4   :  { %v650_v30 = vadd.f32 %v649_v28, %v635_v29 }
 0x1a6   :  { %651 = vadd.xlane.f32.xlu0 %v650_v30 }
 0x233   :  { %v652_v32 = vpop.xlane.xlu0 %651 }
 0x234   :  { %v653_v33 = vrot.slane %v652_v32, 4 }
 0x236   :  { %v654_v34 = vadd.f32 %v653_v33, %v652_v32 }
 0x238   :  { %v655_v35 = vrot.slane %v654_v34, 2 }
 0x23a   :  { %v656_v36 = vadd.f32 %v655_v35, %v654_v34 }
 0x23c   :  { %v657_v37 = vrot.slane %v656_v36, 1 }
 0x23e   :  { %v658_v38 = vadd.f32 %v657_v37, %v656_v36 }
 0x240   :  { %747 = vpush %v658_v38 }
 0x271   :  { %s748_s3 = spop %747 }
 0x272   :  { %v660_v39 = vstv %s748_s3 }
 0x273   :  { %v662_v41 = vmul.f32 1.4901161e-08, %v660_v39 }
 0x275   :  { %v663_v42 = vadd.f32 %v662_v41, %v661_v40 }
 0x277   :  { %665 = vst.msk [vmem:[#allocation11] sm:$0x1] %vm82_vm0, %v663_v42 }
 0x278   :  { %856 = shalt.err (!%p853_p8)
}
 0x279   :  { %s857_s15 = scalar_lea.hbm %s1000_s4, 16 }
 0x27a   :  { %p858_p9 = scmp.ne.s32.totalorder %s1000_s4, %s857_s15  ;;  %p861_p10 = scmp.lt.u32.totalorder %s857_s15, %s1000_s4 }
 0x27c   :  { %p863_p11 = pnand %p861_p10, %p858_p9 }
 0x27e   :  { %866 = shalt.err (!%p863_p11)
}
 0x27f   :  { %675 = dma.vmem_to_hbm [thread:$0]  %s673_s28, 16, %s1000_s4, [#allocation5]  }
 0x280   :  { %873 = dma.done.wait [#allocation5], 16  }
 0x281   :  { %874 = vsyncadd [#allocation5], 4294967280 }
 0x282   :  { %679 = vsyncpa [#allocation4], 1 }
 0x283   :  { %680 = vsyncpa [#allocation7], 1 }
 0x284   :  { %681 = vsyncpa [#allocation10], 1 }
 0x285   :  { %682 = vsyncpa [#allocation5], 1 }

</bundles_post_ra>
